<compile_context>
chip_gen: v7x
topology: tpu7x:2x2x1
jax: 0.10.0
libtpu: 0.0.40
codegen_flags: <defaults>
</compile_context>

<pallas_src>
import math

import jax
import jax.numpy as jnp
from jax.experimental import pallas as pl
from jax.experimental.pallas import tpu as pltpu


def _round_up(n, m):
    return ((n + m - 1) // m) * m


def _make_cin_kernel(split_half):
    def kernel(x_ref, *refs):
        # refs = (W_all_0, b_0, wfc_0, ..., W_all_{L-1}, b_{L-1}, wfc_{L-1}, out_ref)
        o_ref = refs[-1]
        layer_refs = refs[:-1]
        num_layers = len(layer_refs) // 3

        x0 = x_ref[...]                         # (TR, F) float32, rows = (batch, embed) pairs
        num_fields = x0.shape[1]
        h = x0                                  # first layer interacts x with itself
        acc = jnp.zeros((x0.shape[0], 1), dtype=jnp.float32)

        for i in range(num_layers):
            w_ref, b_ref, wfc_ref = layer_refs[3 * i: 3 * i + 3]
            c = b_ref.shape[1]                  # cross layer size C_i

            # One wide MXU matmul per layer: (TR, Fp) @ (Fp, F*C) -> (TR, F*C)
            g = jnp.dot(h, w_ref[...], preferred_element_type=jnp.float32)

            # 1x1 conv on the outer product:  out[r, c] = sum_f x0[r, f] * G[r, f*C + c]
            out = x0[:, 0:1] * g[:, 0:c]
            for f in range(1, num_fields):
                out = out + x0[:, f:f + 1] * g[:, f * c:(f + 1) * c]
            out = jnp.maximum(out + b_ref[...], 0.0)     # bias + ReLU

            if split_half and i != num_layers - 1:
                half = c // 2
                xk = out[:, :half]              # kept half -> contributes to fc
                h = out[:, half:]               # second half feeds the next layer
            else:
                xk = out
                h = out

            # Final fc has output_dim == 1: fold it into a VPU multiply + lane
            # reduction instead of wasting the MXU on a (TR, Ck) x (Ck, 1) matmul.
            acc = acc + jnp.sum(xk * wfc_ref[...], axis=1, keepdims=True)

        o_ref[...] = acc                        # per-(batch, embed) fc partial
    return kernel


def cin_forward(x, conv_w_all, conv_b, fc_w_slices, fc_bias, *, split_half=True,
                max_tile_rows=512):
    """
    x             : (B, F, E) float32
    conv_w_all[i] : (Fp_i, F*C_i) float32, [j, f*C_i + c] == torch_weight[c, f*Fp_i + j]
    conv_b[i]     : (1, C_i) float32
    fc_w_slices[i]: (1, keep_i) float32 slice of the fc weight, in concat order
    fc_bias       : scalar float32
    returns (B, 1) float32
    """
    B, F, E = x.shape
    num_layers = len(conv_w_all)

    # Channel-last row layout: (B, F, E) -> (B*E, F), fields on lanes.
    rows = B * E
    x_rows = jnp.transpose(x, (0, 2, 1)).reshape(rows, F)

    tile_rows = min(max_tile_rows, _round_up(rows, 8))
    rows_pad = _round_up(rows, tile_rows)
    if rows_pad != rows:
        x_rows = jnp.pad(x_rows, ((0, rows_pad - rows), (0, 0)))
    grid = (rows_pad // tile_rows,)

    in_specs = [pl.BlockSpec((tile_rows, F), lambda i: (i, 0))]
    args = [x_rows]
    for li in range(num_layers):
        w, b, wfc = conv_w_all[li], conv_b[li], fc_w_slices[li]
        # Full-array blocks with constant index maps -> weights stay VMEM-resident.
        in_specs.append(pl.BlockSpec(w.shape, lambda i: (0, 0)))
        in_specs.append(pl.BlockSpec(b.shape, lambda i: (0, 0)))
        in_specs.append(pl.BlockSpec(wfc.shape, lambda i: (0, 0)))
        args.extend([w, b, wfc])

    partial = pl.pallas_call(
        _make_cin_kernel(split_half),
        out_shape=jax.ShapeDtypeStruct((rows_pad, 1), jnp.float32),
        grid_spec=pl.GridSpec(
            grid=grid,
            in_specs=in_specs,
            out_specs=pl.BlockSpec((tile_rows, 1), lambda i: (i, 0)),
        ),
        compiler_params=pltpu.CompilerParams(
            dimension_semantics=("parallel",)),     # row tiles shard across TCs on v7x
    )(*args)

    # Tiny XLA epilogue: sum the per-(batch, embed) partials over embed + fc bias.
    y = partial[:rows].reshape(B, E).sum(axis=1, keepdims=True) + fc_bias
    return y


def cin_reference(x, torch_ws, torch_bs, fc_w, fc_b, split_half=True):
    """Pure-JAX port of the PyTorch forward (for correctness checking)."""
    B, F, E = x.shape
    num_layers = len(torch_ws)
    x0 = x[:, :, None, :]                               # (B, F, 1, E)
    h = x
    xs = []
    for i in range(num_layers):
        z = x0 * h[:, None, :, :]                       # (B, F, Fp, E)
        z = z.reshape(B, -1, E)                         # (B, F*Fp, E)
        out = jnp.einsum('ck,bke->bce', torch_ws[i], z,
                         precision=jax.lax.Precision.HIGHEST)
        out = jax.nn.relu(out + torch_bs[i][None, :, None])
        c = out.shape[1]
        if split_half and i != num_layers - 1:
            xk, h = out[:, :c // 2, :], out[:, c // 2:, :]
        else:
            xk, h = out, out
        xs.append(xk)
    s = jnp.concatenate(xs, axis=1).sum(axis=2)         # (B, fc_input_dim)
    return jnp.dot(s, fc_w.T, precision=jax.lax.Precision.HIGHEST) + fc_b


if __name__ == "__main__":
    B, F, E = 8, 4, 8                                   # batch, num_fields, embed_dim
    cross_layer_sizes = (16, 12, 8)
    split_half = True
    num_layers = len(cross_layer_sizes)

    keys = jax.random.split(jax.random.PRNGKey(0), 3 + 2 * num_layers)
    x = jax.random.normal(keys[0], (B, F, E), jnp.float32)

    # --- parameters in the PyTorch layout (for the reference) ------------------
    torch_ws, torch_bs, keep_dims = [], [], []
    prev_dim, fc_input_dim, kidx = F, 0, 1
    for i, c in enumerate(cross_layer_sizes):
        k_in = F * prev_dim
        limit = math.sqrt(6.0 / (k_in + c))
        torch_ws.append(jax.random.uniform(keys[kidx], (c, k_in), jnp.float32,
                                           -limit, limit)); kidx += 1
        torch_bs.append(jax.random.uniform(keys[kidx], (c,), jnp.float32,
                                           -0.1, 0.1)); kidx += 1
        keep = c // 2 if (split_half and i != num_layers - 1) else c
        keep_dims.append(keep)
        prev_dim = keep
        fc_input_dim += keep
    fc_limit = math.sqrt(6.0 / (fc_input_dim + 1))
    fc_w = jax.random.uniform(keys[kidx], (1, fc_input_dim), jnp.float32,
                              -fc_limit, fc_limit); kidx += 1
    fc_b = jax.random.uniform(keys[kidx], (1,), jnp.float32, -0.1, 0.1)

    # --- re-layout parameters once (outside the per-call path) for the kernel --
    conv_w_all, conv_b, fc_w_slices = [], [], []
    prev_dim, off = F, 0
    for i, c in enumerate(cross_layer_sizes):
        fp = prev_dim
        w = torch_ws[i].reshape(c, F, fp)                       # (C, F, Fp)
        conv_w_all.append(jnp.transpose(w, (2, 1, 0)).reshape(fp, F * c))
        conv_b.append(torch_bs[i].reshape(1, c))
        fc_w_slices.append(fc_w[:, off:off + keep_dims[i]])
        off += keep_dims[i]
        prev_dim = keep_dims[i]

    out = cin_forward(x, conv_w_all, conv_b, fc_w_slices, fc_b[0],
                      split_half=split_half)
    out = jax.block_until_ready(out)

    ref = cin_reference(x, torch_ws, torch_bs, fc_w, fc_b, split_half)
    assert out.shape == (B, 1)
    assert bool(jnp.allclose(out, ref, rtol=1e-2, atol=1e-2)), (out, ref)

    print("KERNEL_OK")
</pallas_src>

<mosaic_0001>
module attributes {stable_mosaic.version = 11 : i64} {
  func.func @kernel(%arg0: i32, %arg1: memref<64x4xf32, #tpu.memory_space<vmem>>, %arg2: memref<4x64xf32, #tpu.memory_space<vmem>>, %arg3: memref<1x16xf32, #tpu.memory_space<vmem>>, %arg4: memref<1x8xf32, #tpu.memory_space<vmem>>, %arg5: memref<8x48xf32, #tpu.memory_space<vmem>>, %arg6: memref<1x12xf32, #tpu.memory_space<vmem>>, %arg7: memref<1x6xf32, #tpu.memory_space<vmem>>, %arg8: memref<6x32xf32, #tpu.memory_space<vmem>>, %arg9: memref<1x8xf32, #tpu.memory_space<vmem>>, %arg10: memref<1x8xf32, #tpu.memory_space<vmem>>, %arg11: memref<64x1xf32, #tpu.memory_space<vmem>>) attributes {dimension_semantics = [#tpu.dimension_semantics<parallel>], iteration_bounds = array<i64: 1>, scalar_prefetch = 0 : i64, scratch_operands = 0 : i64, tpu.core_type = #tpu.core_type<tc>, window_params = [{transform_indices = @transform_0, window_bounds = array<i64: 64, 4>}, {pipeline_mode = #tpu.pipeline_mode<synchronous>, transform_indices = @transform_1, window_bounds = array<i64: 4, 64>}, {pipeline_mode = #tpu.pipeline_mode<synchronous>, transform_indices = @transform_2, window_bounds = array<i64: 1, 16>}, {pipeline_mode = #tpu.pipeline_mode<synchronous>, transform_indices = @transform_3, window_bounds = array<i64: 1, 8>}, {pipeline_mode = #tpu.pipeline_mode<synchronous>, transform_indices = @transform_4, window_bounds = array<i64: 8, 48>}, {pipeline_mode = #tpu.pipeline_mode<synchronous>, transform_indices = @transform_5, window_bounds = array<i64: 1, 12>}, {pipeline_mode = #tpu.pipeline_mode<synchronous>, transform_indices = @transform_6, window_bounds = array<i64: 1, 6>}, {pipeline_mode = #tpu.pipeline_mode<synchronous>, transform_indices = @transform_7, window_bounds = array<i64: 6, 32>}, {pipeline_mode = #tpu.pipeline_mode<synchronous>, transform_indices = @transform_8, window_bounds = array<i64: 1, 8>}, {pipeline_mode = #tpu.pipeline_mode<synchronous>, transform_indices = @transform_9, window_bounds = array<i64: 1, 8>}, {transform_indices = @transform_10, window_bounds = array<i64: 64, 1>}]} {
    %c0 = arith.constant 0 : index
    %c0_0 = arith.constant 0 : index
    %0 = vector.load %arg1[%c0, %c0_0] : memref<64x4xf32, #tpu.memory_space<vmem>>, vector<64x4xf32>
    %cst = arith.constant 0.000000e+00 : f32
    %1 = vector.broadcast %cst : f32 to vector<64x1xf32>
    %c0_1 = arith.constant 0 : index
    %c0_2 = arith.constant 0 : index
    %2 = vector.load %arg2[%c0_1, %c0_2] : memref<4x64xf32, #tpu.memory_space<vmem>>, vector<4x64xf32>
    %cst_3 = arith.constant dense<0.000000e+00> : vector<64x64xf32>
    %3 = tpu.matmul %0, %2, %cst_3 {dimension_numbers = #tpu.dot_dimension_numbers<[1], [0], [0], [1], [0, 0, 1, 1], [], []>} : vector<64x4xf32>, vector<4x64xf32>, vector<64x64xf32> -> vector<64x64xf32>
    %4 = vector.extract_strided_slice %0 {offsets = [0, 0], sizes = [64, 1], strides = [1, 1]} : vector<64x4xf32> to vector<64x1xf32>
    %5 = vector.extract_strided_slice %3 {offsets = [0, 0], sizes = [64, 16], strides = [1, 1]} : vector<64x64xf32> to vector<64x16xf32>
    %6 = vector.broadcast %4 : vector<64x1xf32> to vector<64x16xf32>
    %7 = arith.mulf %6, %5 : vector<64x16xf32>
    %8 = vector.extract_strided_slice %0 {offsets = [0, 1], sizes = [64, 1], strides = [1, 1]} : vector<64x4xf32> to vector<64x1xf32>
    %9 = vector.extract_strided_slice %3 {offsets = [0, 16], sizes = [64, 16], strides = [1, 1]} : vector<64x64xf32> to vector<64x16xf32>
    %10 = vector.broadcast %8 : vector<64x1xf32> to vector<64x16xf32>
    %11 = arith.mulf %10, %9 : vector<64x16xf32>
    %12 = arith.addf %7, %11 : vector<64x16xf32>
    %13 = vector.extract_strided_slice %0 {offsets = [0, 2], sizes = [64, 1], strides = [1, 1]} : vector<64x4xf32> to vector<64x1xf32>
    %14 = vector.extract_strided_slice %3 {offsets = [0, 32], sizes = [64, 16], strides = [1, 1]} : vector<64x64xf32> to vector<64x16xf32>
    %15 = vector.broadcast %13 : vector<64x1xf32> to vector<64x16xf32>
    %16 = arith.mulf %15, %14 : vector<64x16xf32>
    %17 = arith.addf %12, %16 : vector<64x16xf32>
    %18 = vector.extract_strided_slice %0 {offsets = [0, 3], sizes = [64, 1], strides = [1, 1]} : vector<64x4xf32> to vector<64x1xf32>
    %19 = vector.extract_strided_slice %3 {offsets = [0, 48], sizes = [64, 16], strides = [1, 1]} : vector<64x64xf32> to vector<64x16xf32>
    %20 = vector.broadcast %18 : vector<64x1xf32> to vector<64x16xf32>
    %21 = arith.mulf %20, %19 : vector<64x16xf32>
    %22 = arith.addf %17, %21 : vector<64x16xf32>
    %c0_4 = arith.constant 0 : index
    %c0_5 = arith.constant 0 : index
    %23 = vector.load %arg3[%c0_4, %c0_5] : memref<1x16xf32, #tpu.memory_space<vmem>>, vector<1x16xf32>
    %24 = vector.broadcast %23 : vector<1x16xf32> to vector<64x16xf32>
    %25 = arith.addf %22, %24 : vector<64x16xf32>
    %cst_6 = arith.constant 0.000000e+00 : f32
    %26 = vector.broadcast %cst_6 : f32 to vector<64x16xf32>
    %27 = arith.maximumf %25, %26 : vector<64x16xf32>
    %28 = vector.extract_strided_slice %27 {offsets = [0, 0], sizes = [64, 8], strides = [1, 1]} : vector<64x16xf32> to vector<64x8xf32>
    %29 = vector.extract_strided_slice %27 {offsets = [0, 8], sizes = [64, 8], strides = [1, 1]} : vector<64x16xf32> to vector<64x8xf32>
    %c0_7 = arith.constant 0 : index
    %c0_8 = arith.constant 0 : index
    %30 = vector.load %arg4[%c0_7, %c0_8] : memref<1x8xf32, #tpu.memory_space<vmem>>, vector<1x8xf32>
    %31 = vector.broadcast %30 : vector<1x8xf32> to vector<64x8xf32>
    %32 = arith.mulf %28, %31 : vector<64x8xf32>
    %cst_9 = arith.constant dense<0.000000e+00> : vector<64xf32>
    %33 = vector.multi_reduction <add>, %32, %cst_9 [1] : vector<64x8xf32> to vector<64xf32>
    %34 = vector.shape_cast %33 : vector<64xf32> to vector<64x1xf32>
    %35 = arith.addf %1, %34 : vector<64x1xf32>
    %c0_10 = arith.constant 0 : index
    %c0_11 = arith.constant 0 : index
    %36 = vector.load %arg5[%c0_10, %c0_11] : memref<8x48xf32, #tpu.memory_space<vmem>>, vector<8x48xf32>
    %cst_12 = arith.constant dense<0.000000e+00> : vector<64x48xf32>
    %37 = tpu.matmul %29, %36, %cst_12 {dimension_numbers = #tpu.dot_dimension_numbers<[1], [0], [0], [1], [0, 0, 1, 1], [], []>} : vector<64x8xf32>, vector<8x48xf32>, vector<64x48xf32> -> vector<64x48xf32>
    %38 = vector.extract_strided_slice %0 {offsets = [0, 0], sizes = [64, 1], strides = [1, 1]} : vector<64x4xf32> to vector<64x1xf32>
    %39 = vector.extract_strided_slice %37 {offsets = [0, 0], sizes = [64, 12], strides = [1, 1]} : vector<64x48xf32> to vector<64x12xf32>
    %40 = vector.broadcast %38 : vector<64x1xf32> to vector<64x12xf32>
    %41 = arith.mulf %40, %39 : vector<64x12xf32>
    %42 = vector.extract_strided_slice %0 {offsets = [0, 1], sizes = [64, 1], strides = [1, 1]} : vector<64x4xf32> to vector<64x1xf32>
    %43 = vector.extract_strided_slice %37 {offsets = [0, 12], sizes = [64, 12], strides = [1, 1]} : vector<64x48xf32> to vector<64x12xf32>
    %44 = vector.broadcast %42 : vector<64x1xf32> to vector<64x12xf32>
    %45 = arith.mulf %44, %43 : vector<64x12xf32>
    %46 = arith.addf %41, %45 : vector<64x12xf32>
    %47 = vector.extract_strided_slice %0 {offsets = [0, 2], sizes = [64, 1], strides = [1, 1]} : vector<64x4xf32> to vector<64x1xf32>
    %48 = vector.extract_strided_slice %37 {offsets = [0, 24], sizes = [64, 12], strides = [1, 1]} : vector<64x48xf32> to vector<64x12xf32>
    %49 = vector.broadcast %47 : vector<64x1xf32> to vector<64x12xf32>
    %50 = arith.mulf %49, %48 : vector<64x12xf32>
    %51 = arith.addf %46, %50 : vector<64x12xf32>
    %52 = vector.extract_strided_slice %0 {offsets = [0, 3], sizes = [64, 1], strides = [1, 1]} : vector<64x4xf32> to vector<64x1xf32>
    %53 = vector.extract_strided_slice %37 {offsets = [0, 36], sizes = [64, 12], strides = [1, 1]} : vector<64x48xf32> to vector<64x12xf32>
    %54 = vector.broadcast %52 : vector<64x1xf32> to vector<64x12xf32>
    %55 = arith.mulf %54, %53 : vector<64x12xf32>
    %56 = arith.addf %51, %55 : vector<64x12xf32>
    %c0_13 = arith.constant 0 : index
    %c0_14 = arith.constant 0 : index
    %57 = vector.load %arg6[%c0_13, %c0_14] : memref<1x12xf32, #tpu.memory_space<vmem>>, vector<1x12xf32>
    %58 = vector.broadcast %57 : vector<1x12xf32> to vector<64x12xf32>
    %59 = arith.addf %56, %58 : vector<64x12xf32>
    %cst_15 = arith.constant 0.000000e+00 : f32
    %60 = vector.broadcast %cst_15 : f32 to vector<64x12xf32>
    %61 = arith.maximumf %59, %60 : vector<64x12xf32>
    %62 = vector.extract_strided_slice %61 {offsets = [0, 0], sizes = [64, 6], strides = [1, 1]} : vector<64x12xf32> to vector<64x6xf32>
    %63 = vector.extract_strided_slice %61 {offsets = [0, 6], sizes = [64, 6], strides = [1, 1]} : vector<64x12xf32> to vector<64x6xf32>
    %c0_16 = arith.constant 0 : index
    %c0_17 = arith.constant 0 : index
    %64 = vector.load %arg7[%c0_16, %c0_17] : memref<1x6xf32, #tpu.memory_space<vmem>>, vector<1x6xf32>
    %65 = vector.broadcast %64 : vector<1x6xf32> to vector<64x6xf32>
    %66 = arith.mulf %62, %65 : vector<64x6xf32>
    %cst_18 = arith.constant dense<0.000000e+00> : vector<64xf32>
    %67 = vector.multi_reduction <add>, %66, %cst_18 [1] : vector<64x6xf32> to vector<64xf32>
    %68 = vector.shape_cast %67 : vector<64xf32> to vector<64x1xf32>
    %69 = arith.addf %35, %68 : vector<64x1xf32>
    %c0_19 = arith.constant 0 : index
    %c0_20 = arith.constant 0 : index
    %70 = vector.load %arg8[%c0_19, %c0_20] : memref<6x32xf32, #tpu.memory_space<vmem>>, vector<6x32xf32>
    %cst_21 = arith.constant dense<0.000000e+00> : vector<64x32xf32>
    %71 = tpu.matmul %63, %70, %cst_21 {dimension_numbers = #tpu.dot_dimension_numbers<[1], [0], [0], [1], [0, 0, 1, 1], [], []>} : vector<64x6xf32>, vector<6x32xf32>, vector<64x32xf32> -> vector<64x32xf32>
    %72 = vector.extract_strided_slice %0 {offsets = [0, 0], sizes = [64, 1], strides = [1, 1]} : vector<64x4xf32> to vector<64x1xf32>
    %73 = vector.extract_strided_slice %71 {offsets = [0, 0], sizes = [64, 8], strides = [1, 1]} : vector<64x32xf32> to vector<64x8xf32>
    %74 = vector.broadcast %72 : vector<64x1xf32> to vector<64x8xf32>
    %75 = arith.mulf %74, %73 : vector<64x8xf32>
    %76 = vector.extract_strided_slice %0 {offsets = [0, 1], sizes = [64, 1], strides = [1, 1]} : vector<64x4xf32> to vector<64x1xf32>
    %77 = vector.extract_strided_slice %71 {offsets = [0, 8], sizes = [64, 8], strides = [1, 1]} : vector<64x32xf32> to vector<64x8xf32>
    %78 = vector.broadcast %76 : vector<64x1xf32> to vector<64x8xf32>
    %79 = arith.mulf %78, %77 : vector<64x8xf32>
    %80 = arith.addf %75, %79 : vector<64x8xf32>
    %81 = vector.extract_strided_slice %0 {offsets = [0, 2], sizes = [64, 1], strides = [1, 1]} : vector<64x4xf32> to vector<64x1xf32>
    %82 = vector.extract_strided_slice %71 {offsets = [0, 16], sizes = [64, 8], strides = [1, 1]} : vector<64x32xf32> to vector<64x8xf32>
    %83 = vector.broadcast %81 : vector<64x1xf32> to vector<64x8xf32>
    %84 = arith.mulf %83, %82 : vector<64x8xf32>
    %85 = arith.addf %80, %84 : vector<64x8xf32>
    %86 = vector.extract_strided_slice %0 {offsets = [0, 3], sizes = [64, 1], strides = [1, 1]} : vector<64x4xf32> to vector<64x1xf32>
    %87 = vector.extract_strided_slice %71 {offsets = [0, 24], sizes = [64, 8], strides = [1, 1]} : vector<64x32xf32> to vector<64x8xf32>
    %88 = vector.broadcast %86 : vector<64x1xf32> to vector<64x8xf32>
    %89 = arith.mulf %88, %87 : vector<64x8xf32>
    %90 = arith.addf %85, %89 : vector<64x8xf32>
    %c0_22 = arith.constant 0 : index
    %c0_23 = arith.constant 0 : index
    %91 = vector.load %arg9[%c0_22, %c0_23] : memref<1x8xf32, #tpu.memory_space<vmem>>, vector<1x8xf32>
    %92 = vector.broadcast %91 : vector<1x8xf32> to vector<64x8xf32>
    %93 = arith.addf %90, %92 : vector<64x8xf32>
    %cst_24 = arith.constant 0.000000e+00 : f32
    %94 = vector.broadcast %cst_24 : f32 to vector<64x8xf32>
    %95 = arith.maximumf %93, %94 : vector<64x8xf32>
    %c0_25 = arith.constant 0 : index
    %c0_26 = arith.constant 0 : index
    %96 = vector.load %arg10[%c0_25, %c0_26] : memref<1x8xf32, #tpu.memory_space<vmem>>, vector<1x8xf32>
    %97 = vector.broadcast %96 : vector<1x8xf32> to vector<64x8xf32>
    %98 = arith.mulf %95, %97 : vector<64x8xf32>
    %cst_27 = arith.constant dense<0.000000e+00> : vector<64xf32>
    %99 = vector.multi_reduction <add>, %98, %cst_27 [1] : vector<64x8xf32> to vector<64xf32>
    %100 = vector.shape_cast %99 : vector<64xf32> to vector<64x1xf32>
    %101 = arith.addf %69, %100 : vector<64x1xf32>
    %c0_28 = arith.constant 0 : index
    %c0_29 = arith.constant 0 : index
    %102 = vector.load %arg11[%c0_28, %c0_29] : memref<64x1xf32, #tpu.memory_space<vmem>>, vector<64x1xf32>
    tpu.vector_store %arg11[%c0_28, %c0_29], %101 {strides = array<i32>} : memref<64x1xf32, #tpu.memory_space<vmem>>, vector<64x1xf32>,
    return
  }
  func.func @transform_0(%arg0: i32) -> (i32, i32) {
    %c0_i32 = arith.constant 0 : i32
    %c0_i32_0 = arith.constant 0 : i32
    return %arg0, %c0_i32 : i32, i32
  }
  func.func @transform_1(%arg0: i32) -> (i32, i32) {
    %c0_i32 = arith.constant 0 : i32
    %c0_i32_0 = arith.constant 0 : i32
    %c0_i32_1 = arith.constant 0 : i32
    return %c0_i32, %c0_i32_0 : i32, i32
  }
  func.func @transform_2(%arg0: i32) -> (i32, i32) {
    %c0_i32 = arith.constant 0 : i32
    %c0_i32_0 = arith.constant 0 : i32
    %c0_i32_1 = arith.constant 0 : i32
    return %c0_i32, %c0_i32_0 : i32, i32
  }
  func.func @transform_3(%arg0: i32) -> (i32, i32) {
    %c0_i32 = arith.constant 0 : i32
    %c0_i32_0 = arith.constant 0 : i32
    %c0_i32_1 = arith.constant 0 : i32
    return %c0_i32, %c0_i32_0 : i32, i32
  }
  func.func @transform_4(%arg0: i32) -> (i32, i32) {
    %c0_i32 = arith.constant 0 : i32
    %c0_i32_0 = arith.constant 0 : i32
    %c0_i32_1 = arith.constant 0 : i32
    return %c0_i32, %c0_i32_0 : i32, i32
  }
  func.func @transform_5(%arg0: i32) -> (i32, i32) {
    %c0_i32 = arith.constant 0 : i32
    %c0_i32_0 = arith.constant 0 : i32
    %c0_i32_1 = arith.constant 0 : i32
    return %c0_i32, %c0_i32_0 : i32, i32
  }
  func.func @transform_6(%arg0: i32) -> (i32, i32) {
    %c0_i32 = arith.constant 0 : i32
    %c0_i32_0 = arith.constant 0 : i32
    %c0_i32_1 = arith.constant 0 : i32
    return %c0_i32, %c0_i32_0 : i32, i32
  }
  func.func @transform_7(%arg0: i32) -> (i32, i32) {
    %c0_i32 = arith.constant 0 : i32
    %c0_i32_0 = arith.constant 0 : i32
    %c0_i32_1 = arith.constant 0 : i32
    return %c0_i32, %c0_i32_0 : i32, i32
  }
  func.func @transform_8(%arg0: i32) -> (i32, i32) {
    %c0_i32 = arith.constant 0 : i32
    %c0_i32_0 = arith.constant 0 : i32
    %c0_i32_1 = arith.constant 0 : i32
    return %c0_i32, %c0_i32_0 : i32, i32
  }
  func.func @transform_9(%arg0: i32) -> (i32, i32) {
    %c0_i32 = arith.constant 0 : i32
    %c0_i32_0 = arith.constant 0 : i32
    %c0_i32_1 = arith.constant 0 : i32
    return %c0_i32, %c0_i32_0 : i32, i32
  }
  func.func @transform_10(%arg0: i32) -> (i32, i32) {
    %c0_i32 = arith.constant 0 : i32
    %c0_i32_0 = arith.constant 0 : i32
    return %arg0, %c0_i32 : i32, i32
  }
}

</mosaic_0001>

<bundles_post_ra>
// kernel: tpu_custom_call.1
= control target key start
LH: loop header
LB: loop body
LE: loop exit
PB: predicated region body
PF: predicated region fallthrough
CT: control target
= control target key end

     0   :  { %vm69_vm0 = vcmask 1043456   ;;  %vm44_vm1 = vcmask 31744   ;;  %v1414_v3 = vmov 2   ;;  %v1415_v10 = vmov 1   ;;  %s1419_s30 = smov 112   ;;  %s1420_s11 = smov 80   ;;  %s2155_s1 = inlined_call_operand.vmem [shape: f32[4,64], index: 1, kind: input, shape index: {}]   ;;  %s2156_s0 = inlined_call_operand.vmem [shape: f32[64,4], index: 0, kind: input, shape index: {}]   ;;  %s2157_s4 = inlined_call_operand.vmem [shape: f32[8,48], index: 4, kind: input, shape index: {}]   ;;  %s2158_s2 = inlined_call_operand.vmem [shape: f32[1,16], index: 2, kind: input, shape index: {}]   ;;  %s2159_s3 = inlined_call_operand.vmem [shape: f32[1,8], index: 3, kind: input, shape index: {}]   ;;  %s2160_s7 = inlined_call_operand.vmem [shape: f32[6,32], index: 7, kind: input, shape index: {}]   ;;  %s2161_s5 = inlined_call_operand.vmem [shape: f32[1,12], index: 5, kind: input, shape index: {}]   ;;  %s2162_s6 = inlined_call_operand.vmem [shape: f32[1,6], index: 6, kind: input, shape index: {}]   ;;  %s2163_s8 = inlined_call_operand.vmem [shape: f32[1,8], index: 8, kind: input, shape index: {}]   ;;  %s2164_s9 = inlined_call_operand.vmem [shape: f32[1,8], index: 9, kind: input, shape index: {}]   ;;  %s2165_s10 = inlined_call_operand.vmem [shape: f32[64,1], index: 10, kind: output, shape index: {}]  }
   0x1   :  { %v43_v0 = vld [vmem:[%s2155_s1] sm:$0xf]  ;;  %1399 = vset.pattern.permute.xlu1 %v1414_v3  ;;  %v36_v4 = vld [vmem:[%s2156_s0 + $0x8] sm:$0xff]  ;;  %v37_v6 = vld [vmem:[%s2156_s0 + $0x10] sm:$0xff]  ;;  %1398 = vset.pattern.permute.xlu0 %v1415_v10  ;;  %v1416_v11 = vmov 3   ;;  %v1417_v12 = vmov 0  }
   0x2   :  { %v1487_v1 = vld [vmem:[%s2156_s0] sm:$0xff]  ;;  %1342 = vmatprep.subr.msk.mxu0 %vm69_vm0, %v43_v0  ;;  %1384 = vmatprep.subr.msk.mxu1 %vm69_vm0, %v43_v0  ;;  %v40_v5 = vld [vmem:[%s2156_s0 + $0x28] sm:$0xff]  ;;  %v41_v7 = vld [vmem:[%s2156_s0 + $0x30] sm:$0xff]  ;;  %s1421_s17 = smov 120   ;;  %vm496_vm2 = vcmask 64512   ;;  %s1424_s18 = smov 92  }
   0x3   :  { %v1492_v2 = vld [vmem:[%s2156_s0 + $0x20] sm:$0xff]  ;;  %1343 = vmatpush3.msk.msra.mxu0 %vm69_vm0, %v43_v0  ;;  %1385 = vmatpush3.msk.msra.mxu1 %vm69_vm0, %v43_v0  ;;  %v38_v8 = vld [vmem:[%s2156_s0 + $0x18] sm:$0xff]  ;;  %vm939_vm3 = vcmask 1045504   ;;  %vm865_vm4 = vcmask 48128   ;;  %vm1270_vm5 = vcmask 7168  }
   0x4   :  { %1344 = vmatprep.mubr.msk.f32.mxu0 %vm44_vm1, %v1487_v1  ;;  %1350 = vmatprep.mubr.msk.f32.mxu1 %vm44_vm1, %v1492_v2  ;;  %v42_v9 = vld [vmem:[%s2156_s0 + $0x38] sm:$0xff]  ;;  %s1418_s0 = smov 96  }
   0x5   :  { %1345 = vmatmul.mubr.msk.f32.vlgmr.msra.gmra.mrb[0].mxu0 %vm44_vm1, %v36_v4  ;;  %1351 = vmatmul.mubr.msk.f32.vlgmr.msra.gmra.mrb[0].mxu1 %vm44_vm1, %v40_v5 }
   0x6   :  { %1347 = vmatprep.mubr.msk.f32.mxu0 %vm44_vm1, %v37_v6  ;;  %1353 = vmatprep.mubr.msk.f32.mxu1 %vm44_vm1, %v41_v7 }
   0x7   :  { %299 = vperm.xlu1 %1399, %v1487_v1   ;;  %219 = vperm.xlu0 %1398, %v1487_v1  }
   0x9   :  { %1348 = vmatmul.mubr.msk.f32.gmra.mrb[2].mxu0 %vm44_vm1, %v38_v8  ;;  %1354 = vmatmul.mubr.msk.f32.gmra.mrb[2].mxu1 %vm44_vm1, %v42_v9 }
   0xb   :  { %303 = vperm.xlu1 %1399, %v36_v4   ;;  %223 = vperm.xlu0 %1398, %v36_v4  }
   0xf   :  { %1400 = vset.pattern.permute.xlu1 %v1416_v11  ;;  %227 = vperm.xlu0 %1398, %v37_v6  }
  0x10   :  { %379 = vperm.xlu1 %1400, %v1487_v1  }
  0x13   :  { %231 = vperm.xlu0 %1398, %v38_v8  }
  0x14   :  { %383 = vperm.xlu1 %1400, %v36_v4  }
  0x17   :  { %1401 = vset.pattern.permute.xlu0 %v1414_v3 }
  0x18   :  { %1402 = vset.pattern.permute.xlu1 %v1414_v3  ;;  %307 = vperm.xlu0 %1401, %v37_v6  }
  0x19   :  { %311 = vperm.xlu1 %1402, %v38_v8  }
  0x1c   :  { %315 = vperm.xlu0 %1401, %v1492_v2  }
  0x1d   :  { %1403 = vset.pattern.permute.xlu1 %v1415_v10 }
  0x1e   :  { %235 = vperm.xlu1 %1403, %v1492_v2  }
  0x20   :  { %323 = vperm.xlu0 %1401, %v41_v7  }
  0x22   :  { %239 = vperm.xlu1 %1403, %v40_v5  }
  0x24   :  { %1408 = vset.pattern.permute.xlu0 %v1416_v11 }
  0x25   :  { %387 = vperm.xlu0 %1408, %v37_v6  }
  0x26   :  { %1404 = vset.pattern.permute.xlu1 %v1416_v11 }
  0x27   :  { %391 = vperm.xlu1 %1404, %v38_v8  }
  0x29   :  { %395 = vperm.xlu0 %1408, %v1492_v2  }
  0x2b   :  { %1405 = vset.pattern.permute.xlu1 %v1414_v3 }
  0x2c   :  { %319 = vperm.xlu1 %1405, %v40_v5  }
  0x2d   :  { %407 = vperm.xlu0 %1408, %v42_v9  }
  0x30   :  { %1406 = vset.pattern.permute.xlu1 %v1415_v10 }
  0x31   :  { %243 = vperm.xlu1 %1406, %v41_v7   ;;  %1412 = vset.pattern.permute.xlu0 %v1417_v12 }
  0x32   :  { %187 = vperm.xlu0 %1412, %v37_v6  }
  0x35   :  { %247 = vperm.xlu1 %1406, %v42_v9  }
  0x36   :  { %199 = vperm.xlu0 %1412, %v40_v5  }
  0x39   :  { %1407 = vset.pattern.permute.xlu1 %v1416_v11 }
  0x3a   :  { %399 = vperm.xlu1 %1407, %v40_v5   ;;  %203 = vperm.xlu0 %1412, %v41_v7  }
  0x3e   :  { %1409 = vset.pattern.permute.xlu1 %v1414_v3  ;;  %207 = vperm.xlu0 %1412, %v42_v9  }
  0x3f   :  { %327 = vperm.xlu1 %1409, %v42_v9  }
  0x42   :  { %1413 = vset.pattern.permute.xlu0 %v1416_v11 }
  0x43   :  { %1410 = vset.pattern.permute.xlu1 %v1416_v11 }
  0x44   :  { %403 = vperm.xlu1 %1410, %v41_v7  }
  0x48   :  { %1411 = vset.pattern.permute.xlu1 %v1417_v12 }
  0x49   :  { %179 = vperm.xlu1 %1411, %v1487_v1  }
  0x4d   :  { %183 = vperm.xlu1 %1411, %v36_v4  }
  0x51   :  { %191 = vperm.xlu1 %1411, %v38_v8  }
  0x55   :  { %195 = vperm.xlu1 %1411, %v1492_v2  }
  0x86   :  { %v1530_v13 = vpop.permute.xlu1 %299  ;;  %v1534_v15 = vpop.permute.xlu0 %219 }
  0x8a   :  { %v1532_v14 = vpop.permute.xlu1 %303  ;;  %v1538_v17 = vpop.permute.xlu0 %223 }
  0x8e   :  { %v1542_v19 = vpop.permute.xlu0 %227 }
  0x8f   :  { %v1536_v16 = vpop.permute.xlu1 %379 }
  0x92   :  { %v1546_v21 = vpop.permute.xlu0 %231 }
  0x93   :  { %v1540_v18 = vpop.permute.xlu1 %383 }
  0x97   :  { %v1550_v23 = vpop.permute.xlu0 %307 }
  0x98   :  { %v1544_v20 = vpop.permute.xlu1 %311 }
  0x9b   :  { %v1554_v25 = vpop.permute.xlu0 %315 }
  0x9d   :  { %v1548_v22 = vpop.permute.xlu1 %235 }
  0x9f   :  { %v1570_v33 = vpop.permute.xlu0 %323 }
  0xa1   :  { %v1552_v24 = vpop.permute.xlu1 %239 }
  0xa4   :  { %v1594_v43 = vpop.permute.xlu0 %387 }
  0xa6   :  { %v1568_v32 = vpop.permute.xlu1 %391 }
  0xa8   :  { %v1604_v46 = vpop.permute.xlu0 %395 }
  0xab   :  { %v1588_v40 = vpop.permute.xlu1 %319 }
  0xac   :  { %v1650_v63 = vpop.permute.xlu0 %407 }
  0xb0   :  { %v1610_v49 = vpop.permute.xlu1 %243 }
  0xb1   :  { %v1668_v6 = vpop.permute.xlu0 %187 }
  0xb4   :  { %v1620_v52 = vpop.permute.xlu1 %247 }
  0xb5   :  { %v1672_v8 = vpop.permute.xlu0 %199 }
  0xb9   :  { %v1632_v57 = vpop.permute.xlu1 %399  ;;  %v1676_v10 = vpop.permute.xlu0 %203 }
  0xbd   :  { %v1680_v12 = vpop.permute.xlu0 %207 }
  0xbe   :  { %v1642_v60 = vpop.permute.xlu1 %327 }
  0xc3   :  { %v1661_v3 = vpop.permute.xlu1 %403 }
  0xc8   :  { %v1666_v5 = vpop.permute.xlu1 %179 }
  0xc9   :  { %2171 = vst [vmem:[#allocation2_spill] sm:$0xff] %v1666_v5 }
  0xcc   :  { %v1670_v7 = vpop.permute.xlu1 %183 }
  0xd0   :  { %v1674_v9 = vpop.permute.xlu1 %191 }
  0xd4   :  { %v1678_v11 = vpop.permute.xlu1 %195 }
  0xd8   :  { %v1556_v26 = vpop.f32.mrb[0].mxu1  ;;  %v1558_v27 = vpop.f32.mrb[0].mxu0 }
  0xd9   :  { %v1560_v28 = vpop.f32.mrb[1].mxu0  ;;  %v1562_v29 = vpop.f32.mrb[1].mxu1  ;;  %v331_v30 = vmul.f32 %v1558_v27, %v1532_v14  ;;  %v251_v31 = vmul.f32 %v1558_v27, %v1538_v17  ;;  %v255_v37 = vmul.f32 %v1556_v26, %v1552_v24  ;;  %v411_v38 = vmul.f32 %v1558_v27, %v1540_v18 }
  0xda   :  { %v335_v41 = vmul.f32 %v1556_v26, %v1588_v40  ;;  %v250_v42 = vmul.f32 %v1534_v15, %v1560_v28  ;;  %v410_v44 = vmul.f32 %v1536_v16, %v1560_v28  ;;  %v330_v45 = vmul.f32 %v1530_v13, %v1560_v28 }
  0xdb   :  { %348 = vrot.lane.b32.xlu1 %v331_v30, %s1418_s0  ;;  %268 = vrot.lane.b32.xlu0 %v251_v31, %s1419_s30  ;;  %v414_v47 = vmul.f32 %v1604_v46, %v1562_v29  ;;  %v254_v48 = vmul.f32 %v1548_v22, %v1562_v29  ;;  %v334_v50 = vmul.f32 %v1554_v25, %v1562_v29  ;;  %v529_v30 = vld [vmem:[%s2157_s4] sm:$0xff] }
  0xdc   :  { %v1574_v34 = vpop.f32.mrb[2].mxu0  ;;  %v1576_v35 = vpop.f32.mrb[2].mxu1  ;;  %v415_v58 = vmul.f32 %v1556_v26, %v1632_v57  ;;  %v211_v31 = vmul.f32 %v1558_v27, %v1670_v7  ;;  %1356 = vmatprep.subr.mxu1 %v529_v30  ;;  %v1696_v27 = vld [vmem:[%s2159_s3] ss:$0 sm:$0xff]  ;;  %s1423_s3 = smov 104  }
  0xdd   :  { %v1578_v36 = vpop.f32.mrb[3].mxu0  ;;  %v1584_v39 = vpop.f32.mrb[3].mxu1  ;;  %v333_v51 = vmul.f32 %v1574_v34, %v1544_v20  ;;  %v413_v53 = vmul.f32 %v1574_v34, %v1568_v32  ;;  %v253_v54 = vmul.f32 %v1574_v34, %v1546_v21  ;;  %v257_v55 = vmul.f32 %v1576_v35, %v1620_v52  ;;  %1357 = vmatpush3.msra.mxu1 %v529_v30 }
  0xde   :  { %v412_v56 = vmul.f32 %v1594_v43, %v1578_v36  ;;  %v252_v59 = vmul.f32 %v1542_v19, %v1578_v36  ;;  %v337_v61 = vmul.f32 %v1576_v35, %v1642_v60  ;;  %v332_v62 = vmul.f32 %v1550_v23, %v1578_v36 }
  0xdf   :  { %276 = vrot.lane.b32.xlu1 %v255_v37, %s1419_s30  ;;  %428 = vrot.lane.b32.xlu0 %v411_v38, %s1420_s11  ;;  %v417_v0 = vmul.f32 %v1576_v35, %v1650_v63  ;;  %v256_v1 = vmul.f32 %v1610_v49, %v1584_v39  ;;  %v336_v2 = vmul.f32 %v1570_v33, %v1584_v39 }
  0xe0   :  { %v416_v4 = vmul.f32 %v1661_v3, %v1584_v39 }
  0xe3   :  { %356 = vrot.lane.b32.xlu0 %v335_v41, %s1418_s0  ;;  %266 = vrot.lane.b32.xlu1 %v250_v42, %s1419_s30 }
  0xe7   :  { %426 = vrot.lane.b32.xlu0 %v410_v44, %s1420_s11  ;;  %346 = vrot.lane.b32.xlu1 %v330_v45, %s1418_s0  ;;  %v1690_v45 = vld [vmem:[%s2158_s2] ss:$0 sm:$0xff]  ;;  %s1422_s2 = smov 116  }
  0xeb   :  { %434 = vrot.lane.b32.xlu0 %v414_v47, %s1420_s11  ;;  %274 = vrot.lane.b32.xlu1 %v254_v48, %s1419_s30 }
  0xef   :  { %354 = vrot.lane.b32.xlu1 %v334_v50, %s1418_s0  ;;  %352 = vrot.lane.b32.xlu0 %v333_v51, %s1418_s0 }
  0xf3   :  { %432 = vrot.lane.b32.xlu0 %v413_v53, %s1420_s11  ;;  %272 = vrot.lane.b32.xlu1 %v253_v54, %s1419_s30  ;;  %v210_v54 = vmul.f32 %v1666_v5, %v1560_v28 }
  0xf7   :  { %280 = vrot.lane.b32.xlu1 %v257_v55, %s1419_s30  ;;  %430 = vrot.lane.b32.xlu0 %v412_v56, %s1420_s11 }
  0xfb   :  { %436 = vrot.lane.b32.xlu0 %v415_v58, %s1420_s11  ;;  %270 = vrot.lane.b32.xlu1 %v252_v59, %s1419_s30 }
  0xff   :  { %360 = vrot.lane.b32.xlu0 %v337_v61, %s1418_s0  ;;  %350 = vrot.lane.b32.xlu1 %v332_v62, %s1418_s0 }
 0x103   :  { %440 = vrot.lane.b32.xlu0 %v417_v0, %s1420_s11  ;;  %278 = vrot.lane.b32.xlu1 %v256_v1, %s1419_s30 }
 0x107   :  { %358 = vrot.lane.b32.xlu1 %v336_v2, %s1418_s0 }
 0x10b   :  { %438 = vrot.lane.b32.xlu1 %v416_v4, %s1420_s11  ;;  %v214_v4 = vmul.f32 %v1678_v11, %v1562_v29 }
 0x14d   :  { %v349_v37 = vpop.permute.xlu1 %348  ;;  %v269_v38 = vpop.permute.xlu0 %268 }
 0x14e   :  { %v291_v41 = vadd.f32 %v269_v38, %v211_v31 }
 0x150   :  { %v371_v42 = vadd.f32 %v349_v37, %v291_v41 }
 0x151   :  { %v277_v44 = vpop.permute.xlu1 %276  ;;  %v429_v47 = vpop.permute.xlu0 %428 }
 0x152   :  { %v451_v48 = vadd.f32 %v429_v47, %v371_v42  ;;  %v213_v47 = vmul.f32 %v1574_v34, %v1674_v9 }
 0x154   :  { %v466_v50 = vadd.f32 %v1690_v45, %v451_v48 }
 0x155   :  { %v357_v51 = vpop.permute.xlu0 %356  ;;  %v267_v53 = vpop.permute.xlu1 %266 }
 0x156   :  { %v474_v55 = vmax.f32 %v466_v50, 0.0  ;;  %v290_v56 = vadd.f32 %v267_v53, %v210_v54  ;;  %v215_v54 = vmul.f32 %v1556_v26, %v1672_v8  ;;  %v217_v26 = vmul.f32 %v1576_v35, %v1680_v12 }
 0x158   :  { %540 = vrot.lane.b32.xlu0 %v474_v55, %s1421_s17  ;;  %v1702_v58 = vmul.f32 %v1696_v27, %v474_v55 }
 0x159   :  { %v427_v59 = vpop.permute.xlu0 %426  ;;  %v347_v61 = vpop.permute.xlu1 %346 }
 0x15a   :  { %v370_v62 = vadd.f32 %v347_v61, %v290_v56 }
 0x15c   :  { %v450_v0 = vadd.f32 %v427_v59, %v370_v62  ;;  %v295_v62 = vadd.f32 %v277_v44, %v215_v54 }
 0x15d   :  { %v435_v1 = vpop.permute.xlu0 %434  ;;  %v275_v2 = vpop.permute.xlu1 %274 }
 0x15e   :  { %v1707_v30 = vadd.f32 %v1690_v45, %v450_v0  ;;  %v294_v28 = vadd.f32 %v275_v2, %v214_v4 }
 0x160   :  { %v2166_v31 = vmax.f32 %v1707_v30, 0.0 }
 0x161   :  { %v355_v37 = vpop.permute.xlu1 %354  ;;  %v353_v38 = vpop.permute.xlu0 %352 }
 0x162   :  { %v374_v41 = vadd.f32 %v355_v37, %v294_v28  ;;  %538 = vrot.lane.b32.xlu1 %v2166_v31, %s1421_s17 }
 0x164   :  { %v454_v42 = vadd.f32 %v435_v1, %v374_v41  ;;  %v375_v1 = vadd.f32 %v357_v51, %v295_v62  ;;  %v212_v41 = vmul.f32 %v1668_v6, %v1578_v36 }
 0x165   :  { %v433_v48 = vpop.permute.xlu0 %432  ;;  %v273_v50 = vpop.permute.xlu1 %272 }
 0x166   :  { %v293_v29 = vadd.f32 %v273_v50, %v213_v47  ;;  %v469_v53 = vadd.f32 %v1690_v45, %v454_v42 }
 0x168   :  { %v373_v55 = vadd.f32 %v353_v38, %v293_v29  ;;  %v477_v56 = vmax.f32 %v469_v53, 0.0 }
 0x169   :  { %v281_v59 = vpop.permute.xlu1 %280  ;;  %v431_v61 = vpop.permute.xlu0 %430 }
 0x16a   :  { %v453_v0 = vadd.f32 %v433_v48, %v373_v55  ;;  %v1719_v2 = vmul.f32 %v1696_v27, %v477_v56  ;;  %v297_v50 = vadd.f32 %v281_v59, %v217_v26 }
 0x16c   :  { %v468_v34 = vadd.f32 %v1690_v45, %v453_v0 }
 0x16d   :  { %v437_v4 = vpop.permute.xlu0 %436  ;;  %v271_v28 = vpop.permute.xlu1 %270 }
 0x16e   :  { %v455_v37 = vadd.f32 %v437_v4, %v375_v1  ;;  %v476_v42 = vmax.f32 %v468_v34, 0.0  ;;  %v292_v44 = vadd.f32 %v271_v28, %v212_v41  ;;  %v216_v4 = vmul.f32 %v1676_v10, %v1584_v39 }
 0x170   :  { %v470_v38 = vadd.f32 %v1690_v45, %v455_v37  ;;  %544 = vrot.lane.b32.xlu0 %v476_v42, %s1421_s17  ;;  %v1729_v47 = vmul.f32 %v1696_v27, %v476_v42 }
 0x171   :  { %v361_v51 = vpop.permute.xlu0 %360  ;;  %v351_v48 = vpop.permute.xlu1 %350 }
 0x172   :  { %v372_v29 = vadd.f32 %v351_v48, %v292_v44  ;;  %v478_v53 = vmax.f32 %v470_v38, 0.0  ;;  %v377_v54 = vadd.f32 %v361_v51, %v297_v50 }
 0x174   :  { %v452_v55 = vadd.f32 %v431_v61, %v372_v29  ;;  %548 = vrot.lane.b32.xlu0 %v478_v53, %s1421_s17  ;;  %v1733_v36 = vmul.f32 %v1696_v27, %v478_v53 }
 0x175   :  { %v441_v35 = vpop.permute.xlu0 %440  ;;  %v279_v62 = vpop.permute.xlu1 %278 }
 0x176   :  { %v457_v0 = vadd.f32 %v441_v35, %v377_v54  ;;  %v467_v1 = vadd.f32 %v1690_v45, %v452_v55  ;;  %v296_v37 = vadd.f32 %v279_v62, %v216_v4 }
 0x178   :  { %v472_v34 = vadd.f32 %v1690_v45, %v457_v0  ;;  %v475_v59 = vmax.f32 %v467_v1, 0.0 }
 0x179   :  { %v359_v28 = vpop.permute.xlu1 %358 }
 0x17a   :  { %542 = vrot.lane.b32.xlu1 %v475_v59, %s1421_s17  ;;  %v480_v61 = vmax.f32 %v472_v34, 0.0  ;;  %v1741_v41 = vmul.f32 %v1696_v27, %v475_v59  ;;  %v376_v42 = vadd.f32 %v359_v28, %v296_v37 }
 0x17c   :  { %552 = vrot.lane.b32.xlu0 %v480_v61, %s1421_s17  ;;  %v1745_v26 = vmul.f32 %v1696_v27, %v480_v61 }
 0x17d   :  { %v439_v38 = vpop.permute.xlu1 %438 }
 0x17e   :  { %v456_v44 = vadd.f32 %v439_v38, %v376_v42  ;;  %546 = vrot.lane.b32.xlu1 %v477_v56, %s1421_s17 }
 0x180   :  { %v471_v39 = vadd.f32 %v1690_v45, %v456_v44 }
 0x182   :  { %v479_v51 = vmax.f32 %v471_v39, 0.0 }
 0x184   :  { %550 = vrot.lane.b32.xlu1 %v479_v51, %s1421_s17  ;;  %v1751_v48 = vmul.f32 %v1696_v27, %v479_v51 }
 0x1ca   :  { %v541_v29 = vpop.permute.xlu0 %540 }
 0x1d4   :  { %v539_v50 = vpop.permute.xlu1 %538 }
 0x1d5   :  { %1358 = vmatprep.mubr.msk.f32.mxu1 %vm496_vm2, %v539_v50 }
 0x1d6   :  { %1359 = vmatmul.mubr.msk.f32.vlgmr.msra.gmra.mrb[4].mxu1 %vm496_vm2, %v541_v29 }
 0x1e2   :  { %v545_v53 = vpop.permute.xlu0 %544 }
 0x1e6   :  { %v549_v56 = vpop.permute.xlu0 %548 }
 0x1ec   :  { %v543_v54 = vpop.permute.xlu1 %542 }
 0x1ed   :  { %1361 = vmatprep.mubr.msk.f32.mxu1 %vm496_vm2, %v543_v54 }
 0x1ee   :  { %1362 = vmatmul.mubr.msk.f32.gmra.mrb[6].mxu1 %vm496_vm2, %v545_v53  ;;  %v553_v35 = vpop.permute.xlu0 %552 }
 0x1f0   :  { %v547_v45 = vpop.permute.xlu1 %546 }
 0x1f1   :  { %1364 = vmatprep.mubr.msk.f32.mxu1 %vm496_vm2, %v547_v45 }
 0x1f2   :  { %1365 = vmatmul.mubr.msk.f32.gmra.mrb[8].mxu1 %vm496_vm2, %v549_v56 }
 0x1f6   :  { %v551_v55 = vpop.permute.xlu1 %550 }
 0x1f7   :  { %1367 = vmatprep.mubr.msk.f32.mxu1 %vm496_vm2, %v551_v55 }
 0x1f8   :  { %1368 = vmatmul.mubr.msk.f32.gmra.mrb[10].mxu1 %vm496_vm2, %v553_v35 }
 0x2a9   :  { %v1761_v62 = vpop.f32.mrb[4].mxu1 }
 0x2aa   :  { %v1763_v0 = vpop.f32.mrb[5].mxu1  ;;  %v684_v1 = vmul.f32 %v1761_v62, %v1538_v17  ;;  %v732_v4 = vmul.f32 %v1761_v62, %v1532_v14  ;;  %v780_v28 = vmul.f32 %v1761_v62, %v1540_v18 }
 0x2ab   :  { %v683_v34 = vmul.f32 %v1763_v0, %v1534_v15  ;;  %v731_v59 = vmul.f32 %v1763_v0, %v1530_v13  ;;  %v779_v37 = vmul.f32 %v1763_v0, %v1536_v16 }
 0x2ac   :  { %701 = vrot.lane.b32.xlu0 %v684_v1, %s1422_s2 }
 0x2ad   :  { %699 = vrot.lane.b32.xlu1 %v683_v34, %s1422_s2 }
 0x2b0   :  { %749 = vrot.lane.b32.xlu0 %v732_v4, %s1423_s3 }
 0x2b1   :  { %747 = vrot.lane.b32.xlu1 %v731_v59, %s1423_s3 }
 0x2b4   :  { %797 = vrot.lane.b32.xlu0 %v780_v28, %s1424_s18 }
 0x2b8   :  { %795 = vrot.lane.b32.xlu0 %v779_v37, %s1424_s18 }
 0x2c1   :  { %v1783_v61 = vpop.f32.mrb[6].mxu1 }
 0x2c2   :  { %v1785_v42 = vpop.f32.mrb[7].mxu1  ;;  %v734_v38 = vmul.f32 %v1783_v61, %v1544_v20  ;;  %v686_v44 = vmul.f32 %v1783_v61, %v1546_v21  ;;  %v782_v50 = vmul.f32 %v1783_v61, %v1568_v32 }
 0x2c3   :  { %v685_v29 = vmul.f32 %v1785_v42, %v1542_v19  ;;  %v781_v53 = vmul.f32 %v1785_v42, %v1594_v43  ;;  %v733_v54 = vmul.f32 %v1785_v42, %v1550_v23 }
 0x2c4   :  { %753 = vrot.lane.b32.xlu0 %v734_v38, %s1423_s3  ;;  %705 = vrot.lane.b32.xlu1 %v686_v44, %s1422_s2 }
 0x2c5   :  { %v1793_v39 = vpop.f32.mrb[8].mxu1 }
 0x2c6   :  { %v1795_v51 = vpop.f32.mrb[9].mxu1  ;;  %v736_v55 = vmul.f32 %v1793_v39, %v1588_v40  ;;  %v688_v35 = vmul.f32 %v1793_v39, %v1552_v24  ;;  %v784_v1 = vmul.f32 %v1793_v39, %v1632_v57 }
 0x2c7   :  { %v687_v34 = vmul.f32 %v1795_v51, %v1548_v22  ;;  %v783_v4 = vmul.f32 %v1795_v51, %v1604_v46  ;;  %v735_v59 = vmul.f32 %v1795_v51, %v1554_v25 }
 0x2c8   :  { %801 = vrot.lane.b32.xlu0 %v782_v50, %s1424_s18  ;;  %703 = vrot.lane.b32.xlu1 %v685_v29, %s1422_s2 }
 0x2cb   :  { %v1807_v45 = vpop.f32.mrb[10].mxu1 }
 0x2cc   :  { %799 = vrot.lane.b32.xlu0 %v781_v53, %s1424_s18  ;;  %751 = vrot.lane.b32.xlu1 %v733_v54, %s1423_s3  ;;  %v1811_v56 = vpop.f32.mrb[11].mxu1  ;;  %v738_v28 = vmul.f32 %v1807_v45, %v1642_v60  ;;  %v690_v37 = vmul.f32 %v1807_v45, %v1620_v52  ;;  %v786_v44 = vmul.f32 %v1807_v45, %v1650_v63 }
 0x2cd   :  { %v689_v38 = vmul.f32 %v1811_v56, %v1610_v49  ;;  %v737_v50 = vmul.f32 %v1811_v56, %v1570_v33  ;;  %v785_v29 = vmul.f32 %v1811_v56, %v1661_v3 }
 0x2d0   :  { %757 = vrot.lane.b32.xlu0 %v736_v55, %s1423_s3  ;;  %709 = vrot.lane.b32.xlu1 %v688_v35, %s1422_s2  ;;  %v898_v55 = vld [vmem:[%s2160_s7] sm:$0x3f]  ;;  %v676_v35 = vmul.f32 %v1761_v62, %v1670_v7  ;;  %s1425_s7 = smov 122  }
 0x2d1   :  { %1370 = vmatprep.subr.msk.mxu0 %vm939_vm3, %v898_v55 }
 0x2d2   :  { %1371 = vmatpush3.msk.msra.mxu0 %vm939_vm3, %v898_v55 }
 0x2d4   :  { %805 = vrot.lane.b32.xlu0 %v784_v1, %s1424_s18  ;;  %707 = vrot.lane.b32.xlu1 %v687_v34, %s1422_s2 }
 0x2d8   :  { %803 = vrot.lane.b32.xlu0 %v783_v4, %s1424_s18  ;;  %755 = vrot.lane.b32.xlu1 %v735_v59, %s1423_s3  ;;  %v675_v4 = vmul.f32 %v1763_v0, %v1666_v5 }
 0x2dc   :  { %761 = vrot.lane.b32.xlu0 %v738_v28, %s1423_s3  ;;  %713 = vrot.lane.b32.xlu1 %v690_v37, %s1422_s2  ;;  %v1859_v37 = vld [vmem:[%s2161_s5] ss:$0 sm:$0xff] }
 0x2e0   :  { %809 = vrot.lane.b32.xlu0 %v786_v44, %s1424_s18  ;;  %711 = vrot.lane.b32.xlu1 %v689_v38, %s1422_s2 }
 0x2e4   :  { %759 = vrot.lane.b32.xlu1 %v737_v50, %s1423_s3 }
 0x2e8   :  { %807 = vrot.lane.b32.xlu1 %v785_v29, %s1424_s18 }
 0x31e   :  { %v702_v53 = vpop.permute.xlu0 %701 }
 0x31f   :  { %v700_v54 = vpop.permute.xlu1 %699  ;;  %v724_v34 = vadd.f32 %v702_v53, %v676_v35 }
 0x320   :  { %v723_v44 = vadd.f32 %v700_v54, %v675_v4  ;;  %v678_v54 = vmul.f32 %v1783_v61, %v1674_v9 }
 0x322   :  { %v750_v1 = vpop.permute.xlu0 %749 }
 0x323   :  { %v772_v59 = vadd.f32 %v750_v1, %v724_v34  ;;  %v748_v28 = vpop.permute.xlu1 %747 }
 0x324   :  { %v771_v29 = vadd.f32 %v748_v28, %v723_v44  ;;  %v677_v44 = vmul.f32 %v1785_v42, %v1668_v6 }
 0x326   :  { %v798_v38 = vpop.permute.xlu0 %797 }
 0x327   :  { %v820_v50 = vadd.f32 %v798_v38, %v772_v59 }
 0x329   :  { %v1862_v62 = vadd.f32 %v1859_v37, %v820_v50 }
 0x32a   :  { %v796_v31 = vpop.permute.xlu0 %795 }
 0x32b   :  { %v2167_v53 = vmax.f32 %v1862_v62, 0.0  ;;  %v819_v55 = vadd.f32 %v796_v31, %v771_v29 }
 0x32d   :  { %v1866_v0 = vadd.f32 %v1859_v37, %v819_v55  ;;  %909 = vrot.lane.b32.xlu0 %v2167_v53, %s1425_s7 }
 0x32f   :  { %v2168_v35 = vmax.f32 %v1866_v0, 0.0 }
 0x331   :  { %907 = vrot.lane.b32.xlu1 %v2168_v35, %s1425_s7 }
 0x336   :  { %v754_v1 = vpop.permute.xlu0 %753  ;;  %v706_v34 = vpop.permute.xlu1 %705 }
 0x337   :  { %v726_v31 = vadd.f32 %v706_v34, %v678_v54  ;;  %v680_v54 = vmul.f32 %v1793_v39, %v1672_v8 }
 0x339   :  { %v774_v4 = vadd.f32 %v754_v1, %v726_v31 }
 0x33a   :  { %v802_v59 = vpop.permute.xlu0 %801  ;;  %v704_v28 = vpop.permute.xlu1 %703 }
 0x33b   :  { %v822_v38 = vadd.f32 %v802_v59, %v774_v4  ;;  %v725_v29 = vadd.f32 %v704_v28, %v677_v44 }
 0x33d   :  { %v1880_v50 = vadd.f32 %v1859_v37, %v822_v38 }
 0x33e   :  { %v800_v55 = vpop.permute.xlu0 %799  ;;  %v752_v53 = vpop.permute.xlu1 %751 }
 0x33f   :  { %v2170_v35 = vmax.f32 %v1880_v50, 0.0  ;;  %v773_v5 = vadd.f32 %v752_v53, %v725_v29 }
 0x341   :  { %v821_v61 = vadd.f32 %v800_v55, %v773_v5  ;;  %913 = vrot.lane.b32.xlu0 %v2170_v35, %s1425_s7  ;;  %v679_v5 = vmul.f32 %v1795_v51, %v1678_v11  ;;  %v682_v51 = vmul.f32 %v1807_v45, %v1680_v12  ;;  %v681_v45 = vmul.f32 %v1811_v56, %v1676_v10 }
 0x342   :  { %v758_v1 = vpop.permute.xlu0 %757  ;;  %v710_v34 = vpop.permute.xlu1 %709  ;;  %v2172_v56 = vmax.f32 %v1707_v30, 0.0 }
 0x343   :  { %v728_v42 = vadd.f32 %v710_v34, %v680_v54  ;;  %v1889_v31 = vadd.f32 %v1859_v37, %v821_v61 }
 0x345   :  { %v776_v4 = vadd.f32 %v758_v1, %v728_v42  ;;  %v844_v59 = vmax.f32 %v1889_v31, 0.0 }
 0x346   :  { %v806_v28 = vpop.permute.xlu0 %805  ;;  %v708_v38 = vpop.permute.xlu1 %707 }
 0x347   :  { %v824_v53 = vadd.f32 %v806_v28, %v776_v4  ;;  %911 = vrot.lane.b32.xlu1 %v844_v59, %s1425_s7  ;;  %v727_v44 = vadd.f32 %v708_v38, %v679_v5 }
 0x349   :  { %v1898_v39 = vadd.f32 %v1859_v37, %v824_v53 }
 0x34a   :  { %v804_v29 = vpop.permute.xlu0 %803  ;;  %v756_v55 = vpop.permute.xlu1 %755 }
 0x34b   :  { %v847_v61 = vmax.f32 %v1898_v39, 0.0  ;;  %v775_v54 = vadd.f32 %v756_v55, %v727_v44 }
 0x34d   :  { %v823_v1 = vadd.f32 %v804_v29, %v775_v54  ;;  %917 = vrot.lane.b32.xlu0 %v847_v61, %s1425_s7 }
 0x34e   :  { %v762_v34 = vpop.permute.xlu0 %761  ;;  %v714_v42 = vpop.permute.xlu1 %713 }
 0x34f   :  { %v1907_v4 = vadd.f32 %v1859_v37, %v823_v1  ;;  %v730_v28 = vadd.f32 %v714_v42, %v682_v51 }
 0x351   :  { %v846_v38 = vmax.f32 %v1907_v4, 0.0  ;;  %v778_v53 = vadd.f32 %v762_v34, %v730_v28 }
 0x352   :  { %v810_v5 = vpop.permute.xlu0 %809  ;;  %v712_v35 = vpop.permute.xlu1 %711 }
 0x353   :  { %v826_v44 = vadd.f32 %v810_v5, %v778_v53  ;;  %915 = vrot.lane.b32.xlu1 %v846_v38, %s1425_s7  ;;  %v729_v1 = vadd.f32 %v712_v35, %v681_v45  ;;  %v488_v35 = vmul.f32 %v1696_v27, %v2172_v56 }
 0x355   :  { %v1914_v29 = vadd.f32 %v1859_v37, %v826_v44  ;;  %v497_v5 = vsel %vm496_vm2, %v488_v35, 0.0 }
 0x356   :  { %v760_v55 = vpop.permute.xlu1 %759 }
 0x357   :  { %v849_v54 = vmax.f32 %v1914_v29, 0.0  ;;  %v777_v51 = vadd.f32 %v760_v55, %v729_v1 }
 0x359   :  { %921 = vrot.lane.b32.xlu0 %v849_v54, %s1425_s7 }
 0x35a   :  { %v808_v34 = vpop.permute.xlu1 %807 }
 0x35b   :  { %v825_v42 = vadd.f32 %v808_v34, %v777_v51 }
 0x35d   :  { %v1923_v28 = vadd.f32 %v1859_v37, %v825_v42 }
 0x35f   :  { %v848_v53 = vmax.f32 %v1923_v28, 0.0  ;;  %v518_v28 = vsel %vm496_vm2, %v1745_v26, 0.0  ;;  %v2176_v26 = vld [vmem:[#allocation2_spill] sm:$0xff] }
 0x361   :  { %919 = vrot.lane.b32.xlu1 %v848_v53, %s1425_s7 }
 0x385   :  { %498 = vadd.xlane.f32.xlu1 %v497_v5 }
 0x39f   :  { %v910_v45 = vpop.permute.xlu0 %909 }
 0x3a3   :  { %v908_v44 = vpop.permute.xlu1 %907 }
 0x3a4   :  { %1372 = vmatprep.mubr.msk.f32.mxu0 %vm865_vm4, %v908_v44 }
 0x3a5   :  { %1373 = vmatmul.mubr.msk.f32.vlgmr.msra.gmra.mrb[4].mxu0 %vm865_vm4, %v910_v45 }
 0x3b3   :  { %v914_v55 = vpop.permute.xlu0 %913 }
 0x3b9   :  { %v912_v37 = vpop.permute.xlu1 %911 }
 0x3ba   :  { %1375 = vmatprep.mubr.msk.f32.mxu0 %vm865_vm4, %v912_v37 }
 0x3bb   :  { %1376 = vmatmul.mubr.msk.f32.gmra.mrb[6].mxu0 %vm865_vm4, %v914_v55 }
 0x3bf   :  { %v918_v30 = vpop.permute.xlu0 %917 }
 0x3c5   :  { %v916_v1 = vpop.permute.xlu1 %915 }
 0x3c6   :  { %1378 = vmatprep.mubr.msk.f32.mxu0 %vm865_vm4, %v916_v1 }
 0x3c7   :  { %1379 = vmatmul.mubr.msk.f32.gmra.mrb[8].mxu0 %vm865_vm4, %v918_v30 }
 0x3cb   :  { %v922_v51 = vpop.permute.xlu0 %921 }
 0x3d3   :  { %v920_v27 = vpop.permute.xlu1 %919 }
 0x3d4   :  { %1381 = vmatprep.mubr.msk.f32.mxu0 %vm865_vm4, %v920_v27 }
 0x3d5   :  { %1382 = vmatmul.mubr.msk.f32.gmra.mrb[10].mxu0 %vm865_vm4, %v922_v51  ;;  %v509_v51 = vsel %vm496_vm2, %v1719_v2, 0.0 }
 0x478   :  { %v1941_v34 = vpop.f32.mrb[4].mxu0 }
 0x479   :  { %v1105_v42 = vmul.f32 %v1941_v34, %v1532_v14  ;;  %v1945_v56 = vpop.f32.mrb[5].mxu0  ;;  %v1057_v35 = vmul.f32 %v1941_v34, %v1538_v17  ;;  %v1153_v44 = vmul.f32 %v1941_v34, %v1540_v18  ;;  %v1049_v4 = vmul.f32 %v1941_v34, %v1670_v7  ;;  %v2070_v7 = vld [vmem:[%s2163_s8] ss:$0 sm:$0xff] }
 0x47a   :  { %v1152_v5 = vmul.f32 %v1945_v56, %v1536_v16  ;;  %v1056_v14 = vmul.f32 %v1945_v56, %v1534_v15  ;;  %v1104_v17 = vmul.f32 %v1945_v56, %v1530_v13 }
 0x47b   :  { %1122 = vrot.lane.b32.xlu1 %v1105_v42, %s1419_s30  ;;  %1074 = vrot.lane.b32.xlu0 %v1057_v35, %s1421_s17  ;;  %v2173_v42 = vmax.f32 %v1866_v0, 0.0  ;;  %v506_v0 = vsel %vm496_vm2, %v1729_v47, 0.0 }
 0x47f   :  { %1170 = vrot.lane.b32.xlu0 %v1153_v44, %s1423_s3  ;;  %1168 = vrot.lane.b32.xlu1 %v1152_v5, %s1423_s3  ;;  %v503_v5 = vsel %vm496_vm2, %v1741_v41, 0.0  ;;  %v512_v41 = vsel %vm496_vm2, %v1733_v36, 0.0 }
 0x483   :  { %1072 = vrot.lane.b32.xlu0 %v1056_v14, %s1421_s17 }
 0x487   :  { %1120 = vrot.lane.b32.xlu0 %v1104_v17, %s1419_s30 }
 0x48e   :  { %v1963_v45 = vpop.f32.mrb[6].mxu0 }
 0x48f   :  { %v1059_v16 = vmul.f32 %v1963_v45, %v1546_v21  ;;  %v1967_v18 = vpop.f32.mrb[7].mxu0  ;;  %v1107_v15 = vmul.f32 %v1963_v45, %v1544_v20  ;;  %v1155_v13 = vmul.f32 %v1963_v45, %v1568_v32 }
 0x490   :  { %v1154_v37 = vmul.f32 %v1967_v18, %v1594_v43  ;;  %v1058_v55 = vmul.f32 %v1967_v18, %v1542_v19  ;;  %v1106_v20 = vmul.f32 %v1967_v18, %v1550_v23 }
 0x491   :  { %1078 = vrot.lane.b32.xlu0 %v1059_v16, %s1421_s17 }
 0x492   :  { %1172 = vrot.lane.b32.xlu1 %v1154_v37, %s1423_s3 }
 0x495   :  { %1126 = vrot.lane.b32.xlu0 %v1107_v15, %s1419_s30 }
 0x499   :  { %1174 = vrot.lane.b32.xlu0 %v1155_v13, %s1423_s3 }
 0x49a   :  { %v1979_v21 = vpop.f32.mrb[8].mxu0 }
 0x49b   :  { %v1983_v43 = vpop.f32.mrb[9].mxu0  ;;  %v1061_v32 = vmul.f32 %v1979_v21, %v1552_v24  ;;  %v1109_v19 = vmul.f32 %v1979_v21, %v1588_v40  ;;  %v1157_v23 = vmul.f32 %v1979_v21, %v1632_v57 }
 0x49c   :  { %v1156_v1 = vmul.f32 %v1983_v43, %v1604_v46  ;;  %v1060_v40 = vmul.f32 %v1983_v43, %v1548_v22 }
 0x49d   :  { %1076 = vrot.lane.b32.xlu0 %v1058_v55, %s1421_s17  ;;  %v2175_v55 = vmax.f32 %v1880_v50, 0.0 }
 0x49e   :  { %1176 = vrot.lane.b32.xlu1 %v1156_v1, %s1423_s3 }
 0x4a1   :  { %1124 = vrot.lane.b32.xlu0 %v1106_v20, %s1419_s30 }
 0x4a5   :  { %1082 = vrot.lane.b32.xlu0 %v1061_v32, %s1421_s17 }
 0x4a8   :  { %v1997_v30 = vpop.f32.mrb[10].mxu0 }
 0x4a9   :  { %1130 = vrot.lane.b32.xlu0 %v1109_v19, %s1419_s30  ;;  %v2000_v46 = vpop.f32.mrb[11].mxu0  ;;  %v1063_v57 = vmul.f32 %v1997_v30, %v1620_v52  ;;  %v500_v52 = vsel %vm496_vm2, %v1702_v58, 0.0 }
 0x4aa   :  { %v1110_v27 = vmul.f32 %v2000_v46, %v1570_v33  ;;  %v1158_v24 = vmul.f32 %v2000_v46, %v1661_v3  ;;  %v1108_v33 = vmul.f32 %v1983_v43, %v1554_v25  ;;  %v1111_v3 = vmul.f32 %v1997_v30, %v1642_v60  ;;  %v1303_v60 = vld [vmem:[%s2162_s6] ss:$0 sm:$0xff] }
 0x4ab   :  { %v1062_v22 = vmul.f32 %v2000_v46, %v1610_v49  ;;  %v1159_v25 = vmul.f32 %v1997_v30, %v1650_v63  ;;  %v515_v49 = vsel %vm496_vm2, %v1751_v48, 0.0  ;;  %v857_v63 = vmul.f32 %v1303_v60, %v2173_v42 }
 0x4ac   :  { %1132 = vrot.lane.b32.xlu1 %v1110_v27, %s1419_s30  ;;  %v859_v58 = vmul.f32 %v1303_v60, %v844_v59  ;;  %v861_v44 = vmul.f32 %v1303_v60, %v846_v38  ;;  %v863_v31 = vmul.f32 %v1303_v60, %v848_v53  ;;  %v2053_v59 = vpop.xlane.xlu1 %498  ;;  %v2174_v53 = vmax.f32 %v1862_v62, 0.0 }
 0x4ad   :  { %1178 = vrot.lane.b32.xlu0 %v1157_v23, %s1423_s3  ;;  %v866_v35 = vsel %vm865_vm4, %v857_v63, 0.0  ;;  %v860_v1 = vmul.f32 %v1303_v60, %v2175_v55  ;;  %v1048_v62 = vmul.f32 %v1945_v56, %v2176_v26  ;;  %v862_v19 = vmul.f32 %v1303_v60, %v847_v61  ;;  %v2084_v56 = vld [vmem:[%s2164_s9] ss:$0 sm:$0xff] }
 0x4ae   :  { %v872_v2 = vsel %vm865_vm4, %v859_v58, 0.0  ;;  %v878_v48 = vsel %vm865_vm4, %v861_v44, 0.0  ;;  %v884_v14 = vsel %vm865_vm4, %v863_v31, 0.0  ;;  %v858_v16 = vmul.f32 %v1303_v60, %v2174_v53 }
 0x4af   :  { %v875_v32 = vsel %vm865_vm4, %v860_v1, 0.0 }
 0x4b0   :  { %1180 = vrot.lane.b32.xlu1 %v1158_v24, %s1423_s3  ;;  %v869_v36 = vsel %vm865_vm4, %v858_v16, 0.0 }
 0x4b1   :  { %1080 = vrot.lane.b32.xlu0 %v1060_v40, %s1421_s17 }
 0x4b5   :  { %1128 = vrot.lane.b32.xlu0 %v1108_v33, %s1419_s30  ;;  %v881_v33 = vsel %vm865_vm4, %v862_v19, 0.0 }
 0x4b9   :  { %1086 = vrot.lane.b32.xlu0 %v1063_v57, %s1421_s17  ;;  %v864_v57 = vmul.f32 %v1303_v60, %v849_v54  ;;  %v1051_v60 = vmul.f32 %v1963_v45, %v1674_v9 }
 0x4bb   :  { %v887_v61 = vsel %vm865_vm4, %v864_v57, 0.0 }
 0x4bd   :  { %1134 = vrot.lane.b32.xlu0 %v1111_v3, %s1419_s30 }
 0x4c1   :  { %1084 = vrot.lane.b32.xlu0 %v1062_v22, %s1421_s17 }
 0x4c5   :  { %1182 = vrot.lane.b32.xlu0 %v1159_v25, %s1423_s3 }
 0x4d4   :  { %501 = vadd.xlane.f32.xlu1 %v500_v52 }
 0x4d8   :  { %510 = vadd.xlane.f32.xlu1 %v509_v51 }
 0x4dc   :  { %516 = vadd.xlane.f32.xlu1 %v515_v49 }
 0x4e0   :  { %867 = vadd.xlane.f32.xlu1 %v866_v35 }
 0x4e4   :  { %873 = vadd.xlane.f32.xlu1 %v872_v2  ;;  %504 = vadd.xlane.f32.xlu0 %v503_v5 }
 0x4e8   :  { %879 = vadd.xlane.f32.xlu1 %v878_v48  ;;  %507 = vadd.xlane.f32.xlu0 %v506_v0  ;;  %v1050_v48 = vmul.f32 %v1967_v18, %v1668_v6 }
 0x4ec   :  { %885 = vadd.xlane.f32.xlu1 %v884_v14  ;;  %513 = vadd.xlane.f32.xlu0 %v512_v41 }
 0x4ed   :  { %v1075_v38 = vpop.permute.xlu0 %1074  ;;  %v1123_v47 = vpop.permute.xlu1 %1122 }
 0x4ee   :  { %v1097_v17 = vadd.f32 %v1075_v38, %v1049_v4 }
 0x4f0   :  { %v1145_v37 = vadd.f32 %v1123_v47, %v1097_v17  ;;  %519 = vadd.xlane.f32.xlu0 %v518_v28  ;;  %v1053_v28 = vmul.f32 %v1979_v21, %v1672_v8 }
 0x4f1   :  { %v1171_v15 = vpop.permute.xlu0 %1170  ;;  %v1169_v40 = vpop.permute.xlu1 %1168 }
 0x4f2   :  { %v1193_v13 = vadd.f32 %v1171_v15, %v1145_v37 }
 0x4f4   :  { %870 = vadd.xlane.f32.xlu0 %v869_v36  ;;  %v1208_v20 = vadd.f32 %v2070_v7, %v1193_v13 }
 0x4f5   :  { %v1073_v34 = vpop.permute.xlu0 %1072 }
 0x4f6   :  { %v1096_v27 = vadd.f32 %v1073_v34, %v1048_v62  ;;  %v1216_v24 = vmax.f32 %v1208_v20, 0.0  ;;  %v1052_v34 = vmul.f32 %v1983_v43, %v1678_v11  ;;  %v1055_v11 = vmul.f32 %v1997_v30, %v1680_v12 }
 0x4f7   :  { %v1054_v43 = vmul.f32 %v2000_v46, %v1676_v10 }
 0x4f8   :  { %876 = vadd.xlane.f32.xlu0 %v875_v32  ;;  %v1231_v22 = vmul.f32 %v2084_v56, %v1216_v24 }
 0x4f9   :  { %v1121_v50 = vpop.permute.xlu0 %1120 }
 0x4fa   :  { %v1144_v23 = vadd.f32 %v1121_v50, %v1096_v27  ;;  %v1241_v29 = vsel %vm496_vm2, %v1231_v22, 0.0 }
 0x4fc   :  { %v1192_v3 = vadd.f32 %v1169_v40, %v1144_v23  ;;  %882 = vadd.xlane.f32.xlu0 %v881_v33 }
 0x4fe   :  { %v1207_v39 = vadd.f32 %v2070_v7, %v1192_v3 }
 0x500   :  { %v1215_v25 = vmax.f32 %v1207_v39, 0.0  ;;  %888 = vadd.xlane.f32.xlu0 %v887_v61 }
 0x502   :  { %v1230_v52 = vmul.f32 %v2084_v56, %v1215_v25 }
 0x503   :  { %v1079_v51 = vpop.permute.xlu0 %1078 }
 0x504   :  { %1242 = vadd.xlane.f32.xlu0 %v1241_v29  ;;  %v1238_v54 = vsel %vm496_vm2, %v1230_v52, 0.0  ;;  %v1099_v42 = vadd.f32 %v1079_v51, %v1051_v60  ;;  %v1173_v9 = vpop.permute.xlu1 %1172 }
 0x505   :  { %1239 = vadd.xlane.f32.xlu1 %v1238_v54 }
 0x507   :  { %v1127_v49 = vpop.permute.xlu0 %1126 }
 0x508   :  { %v1147_v63 = vadd.f32 %v1127_v49, %v1099_v42 }
 0x50b   :  { %v1175_v35 = vpop.permute.xlu0 %1174 }
 0x50c   :  { %v1195_v58 = vadd.f32 %v1175_v35, %v1147_v63 }
 0x50e   :  { %v1210_v2 = vadd.f32 %v2070_v7, %v1195_v58 }
 0x50f   :  { %v1077_v5 = vpop.permute.xlu0 %1076 }
 0x510   :  { %v1218_v44 = vmax.f32 %v1210_v2, 0.0  ;;  %v1098_v0 = vadd.f32 %v1077_v5, %v1050_v48  ;;  %v1177_v32 = vpop.permute.xlu1 %1176 }
 0x512   :  { %v1233_v31 = vmul.f32 %v2084_v56, %v1218_v44 }
 0x513   :  { %v1125_v14 = vpop.permute.xlu0 %1124 }
 0x514   :  { %v1146_v41 = vadd.f32 %v1125_v14, %v1098_v0  ;;  %v1247_v4 = vsel %vm496_vm2, %v1233_v31, 0.0 }
 0x515   :  { %1248 = vadd.xlane.f32.xlu0 %v1247_v4 }
 0x516   :  { %v1194_v45 = vadd.f32 %v1173_v9, %v1146_v41 }
 0x517   :  { %v1083_v38 = vpop.permute.xlu0 %1082 }
 0x518   :  { %v1209_v17 = vadd.f32 %v2070_v7, %v1194_v45  ;;  %v1101_v16 = vadd.f32 %v1083_v38, %v1053_v28 }
 0x51a   :  { %v1217_v47 = vmax.f32 %v1209_v17, 0.0 }
 0x51b   :  { %v1131_v53 = vpop.permute.xlu0 %1130 }
 0x51c   :  { %v1232_v6 = vmul.f32 %v2084_v56, %v1217_v47  ;;  %v1149_v18 = vadd.f32 %v1131_v53, %v1101_v16 }
 0x51e   :  { %v1244_v37 = vsel %vm496_vm2, %v1232_v6, 0.0  ;;  %v1133_v33 = vpop.permute.xlu1 %1132 }
 0x51f   :  { %v1179_v15 = vpop.permute.xlu0 %1178  ;;  %1245 = vadd.xlane.f32.xlu1 %v1244_v37 }
 0x520   :  { %v1197_v13 = vadd.f32 %v1179_v15, %v1149_v18 }
 0x522   :  { %v1212_v36 = vadd.f32 %v2070_v7, %v1197_v13  ;;  %v1181_v52 = vpop.permute.xlu1 %1180 }
 0x523   :  { %v1081_v55 = vpop.permute.xlu0 %1080 }
 0x524   :  { %v1220_v1 = vmax.f32 %v1212_v36, 0.0  ;;  %v1100_v26 = vadd.f32 %v1081_v55, %v1052_v34 }
 0x526   :  { %v1235_v8 = vmul.f32 %v2084_v56, %v1220_v1 }
 0x527   :  { %v1129_v21 = vpop.permute.xlu0 %1128 }
 0x528   :  { %v1148_v62 = vadd.f32 %v1129_v21, %v1100_v26  ;;  %v1253_v20 = vsel %vm496_vm2, %v1235_v8, 0.0 }
 0x529   :  { %1254 = vadd.xlane.f32.xlu0 %v1253_v20 }
 0x52a   :  { %v1196_v19 = vadd.f32 %v1177_v32, %v1148_v62 }
 0x52b   :  { %v1087_v27 = vpop.permute.xlu0 %1086 }
 0x52c   :  { %v1211_v50 = vadd.f32 %v2070_v7, %v1196_v19  ;;  %v1103_v39 = vadd.f32 %v1087_v27, %v1055_v11 }
 0x52e   :  { %v1219_v23 = vmax.f32 %v1211_v50, 0.0 }
 0x52f   :  { %v1135_v24 = vpop.permute.xlu0 %1134 }
 0x530   :  { %v1234_v40 = vmul.f32 %v2084_v56, %v1219_v23  ;;  %v1151_v22 = vadd.f32 %v1135_v24, %v1103_v39 }
 0x532   :  { %v1250_v57 = vsel %vm496_vm2, %v1234_v40, 0.0 }
 0x533   :  { %v1085_v3 = vpop.permute.xlu0 %1084  ;;  %1251 = vadd.xlane.f32.xlu1 %v1250_v57 }
 0x534   :  { %v1102_v61 = vadd.f32 %v1085_v3, %v1054_v43 }
 0x536   :  { %v1150_v25 = vadd.f32 %v1133_v33, %v1102_v61 }
 0x537   :  { %v1183_v51 = vpop.permute.xlu0 %1182 }
 0x538   :  { %v1198_v29 = vadd.f32 %v1181_v52, %v1150_v25  ;;  %v1199_v54 = vadd.f32 %v1183_v51, %v1151_v22 }
 0x53a   :  { %v1214_v60 = vadd.f32 %v2070_v7, %v1199_v54  ;;  %v1213_v49 = vadd.f32 %v2070_v7, %v1198_v29 }
 0x53c   :  { %v1222_v12 = vmax.f32 %v1214_v60, 0.0  ;;  %v1221_v30 = vmax.f32 %v1213_v49, 0.0 }
 0x53e   :  { %v1236_v10 = vmul.f32 %v2084_v56, %v1221_v30  ;;  %v1237_v46 = vmul.f32 %v2084_v56, %v1222_v12 }
 0x540   :  { %v1256_v42 = vsel %vm496_vm2, %v1236_v10, 0.0  ;;  %v1259_v63 = vsel %vm496_vm2, %v1237_v46, 0.0 }
 0x541   :  { %1257 = vadd.xlane.f32.xlu1 %v1256_v42  ;;  %1260 = vadd.xlane.f32.xlu0 %v1259_v63 }
 0x561   :  { %v502_v35 = vpop.xlane.xlu1 %501 }
 0x565   :  { %v511_v58 = vpop.xlane.xlu1 %510 }
 0x569   :  { %v517_v44 = vpop.xlane.xlu1 %516 }
 0x56d   :  { %v868_v0 = vpop.xlane.xlu1 %867 }
 0x56e   :  { %v890_v17 = vadd.f32 %v868_v0, %v2053_v59 }
 0x571   :  { %v505_v2 = vpop.xlane.xlu0 %504  ;;  %v874_v14 = vpop.xlane.xlu1 %873 }
 0x572   :  { %v892_v59 = vadd.f32 %v874_v14, %v505_v2 }
 0x575   :  { %v508_v5 = vpop.xlane.xlu0 %507  ;;  %v880_v4 = vpop.xlane.xlu1 %879 }
 0x576   :  { %v894_v34 = vadd.f32 %v880_v4, %v511_v58 }
 0x579   :  { %v514_v48 = vpop.xlane.xlu0 %513  ;;  %v886_v45 = vpop.xlane.xlu1 %885 }
 0x57a   :  { %v896_v21 = vadd.f32 %v886_v45, %v517_v44 }
 0x57d   :  { %v520_v7 = vpop.xlane.xlu0 %519 }
 0x581   :  { %v871_v31 = vpop.xlane.xlu0 %870 }
 0x582   :  { %v891_v38 = vadd.f32 %v871_v31, %v502_v35 }
 0x585   :  { %v877_v41 = vpop.xlane.xlu0 %876 }
 0x586   :  { %v893_v6 = vadd.f32 %v877_v41, %v508_v5 }
 0x589   :  { %v883_v9 = vpop.xlane.xlu0 %882 }
 0x58a   :  { %v895_v36 = vadd.f32 %v883_v9, %v514_v48 }
 0x58d   :  { %v889_v56 = vpop.xlane.xlu0 %888 }
 0x58e   :  { %v897_v62 = vadd.f32 %v889_v56, %v520_v7 }
 0x591   :  { %v1243_v47 = vpop.xlane.xlu0 %1242 }
 0x592   :  { %v1263_v28 = vadd.f32 %v1243_v47, %v891_v38  ;;  %v1240_v53 = vpop.xlane.xlu1 %1239 }
 0x593   :  { %v1262_v16 = vadd.f32 %v1240_v53, %v890_v17 }
 0x594   :  { %1272 = vst.msk [vmem:[%s2165_s10 + $0x8] sm:$0xff] %vm1270_vm5, %v1263_v28 }
 0x595   :  { %1271 = vst.msk [vmem:[%s2165_s10] sm:$0xff] %vm1270_vm5, %v1262_v16 }
 0x5a2   :  { %v1249_v18 = vpop.xlane.xlu0 %1248 }
 0x5a3   :  { %v1265_v37 = vadd.f32 %v1249_v18, %v893_v6 }
 0x5a5   :  { %1274 = vst.msk [vmem:[%s2165_s10 + $0x18] sm:$0xff] %vm1270_vm5, %v1265_v37 }
 0x5ac   :  { %v1246_v15 = vpop.xlane.xlu1 %1245 }
 0x5ad   :  { %v1264_v13 = vadd.f32 %v1246_v15, %v892_v59 }
 0x5af   :  { %1273 = vst.msk [vmem:[%s2165_s10 + $0x10] sm:$0xff] %vm1270_vm5, %v1264_v13 }
 0x5b6   :  { %v1255_v55 = vpop.xlane.xlu0 %1254 }
 0x5b7   :  { %v1267_v1 = vadd.f32 %v1255_v55, %v895_v36 }
 0x5b9   :  { %1276 = vst.msk [vmem:[%s2165_s10 + $0x28] sm:$0xff] %vm1270_vm5, %v1267_v1 }
 0x5c0   :  { %v1252_v26 = vpop.xlane.xlu1 %1251 }
 0x5c1   :  { %v1266_v8 = vadd.f32 %v1252_v26, %v894_v34 }
 0x5c3   :  { %1275 = vst.msk [vmem:[%s2165_s10 + $0x20] sm:$0xff] %vm1270_vm5, %v1266_v8 }
 0x5ce   :  { %v1258_v20 = vpop.xlane.xlu1 %1257  ;;  %v1261_v32 = vpop.xlane.xlu0 %1260 }
 0x5cf   :  { %v1268_v19 = vadd.f32 %v1258_v20, %v896_v21  ;;  %v1269_v27 = vadd.f32 %v1261_v32, %v897_v62 }
 0x5d1   :  { %1277 = vst.msk [vmem:[%s2165_s10 + $0x30] sm:$0xff] %vm1270_vm5, %v1268_v19  ;;  %1278 = vst.msk [vmem:[%s2165_s10 + $0x38] sm:$0xff] %vm1270_vm5, %v1269_v27 }

</bundles_post_ra>
